<compile_context>
chip_gen: v7x
topology: tpu7x:2x2x1
jax: 0.10.0
libtpu: 0.0.40
codegen_flags: <defaults>
</compile_context>

<pallas_src>
import jax
import jax.numpy as jnp
from jax.experimental import pallas as pl
from jax.experimental.pallas import tpu as pltpu  # noqa: F401  (not needed at these sizes)


# ---------------------------------------------------------------------------
# Shared in-kernel recurrence
# ---------------------------------------------------------------------------
def _lstm_recurrence(x_ref, wih_ref, whh_ref, b_ref, out_seq_ref=None):
    """Run a full LSTM layer over the sequence held in VMEM.

    x_ref   : (B, T, D)  batch-first layer input
    wih_ref : (D, 4H)    input->gates weights (transposed, g-block pre-scaled by 2)
    whh_ref : (H, 4H)    hidden->gates weights (transposed, g-block pre-scaled by 2)
    b_ref   : (1, 4H)    combined bias b_ih + b_hh (g-block pre-scaled by 2)
    out_seq_ref : optional (B, T, H) output ref; if given, h_t is written per step.
    Returns the final hidden state h_{T-1} as a (B, H) value.
    """
    B, T, D = x_ref.shape
    H = whh_ref.shape[0]
    whh = whh_ref[...]

    # Hoisted input projection for ALL timesteps: one big MXU matmul.
    xg = jnp.dot(x_ref[...].reshape(B * T, D), wih_ref[...],
                 preferred_element_type=jnp.float32) + b_ref[...]
    xg = xg.reshape(B, T, 4 * H)                      # gate pre-activations

    h = jnp.zeros((B, H), jnp.float32)
    c = jnp.zeros((B, H), jnp.float32)
    for t in range(T):                                # statically unrolled time loop
        gates = xg[:, t, :] + jnp.dot(h, whh, preferred_element_type=jnp.float32)
        s = jax.nn.sigmoid(gates)                     # single full-width (B, 4H) pass
        i = s[:, 0 * H:1 * H]
        f = s[:, 1 * H:2 * H]
        g = 2.0 * s[:, 2 * H:3 * H] - 1.0             # == tanh(raw g preact), exact
        o = s[:, 3 * H:4 * H]
        c = f * c + i * g
        h = o * jnp.tanh(c)
        if out_seq_ref is not None:
            out_seq_ref[:, t:t + 1, :] = h[:, None, :]
    return h


# ---------------------------------------------------------------------------
# Pallas kernels
# ---------------------------------------------------------------------------
def lstm_layer_kernel(x_ref, wih_ref, whh_ref, b_ref, out_ref):
    """Non-final LSTM layer: writes the full hidden sequence (B, T, H)."""
    _lstm_recurrence(x_ref, wih_ref, whh_ref, b_ref, out_seq_ref=out_ref)


def lstm_last_layer_fc_kernel(x_ref, wih_ref, whh_ref, b_ref, fcw_ref, fcb_ref, out_ref):
    """Final LSTM layer fused with the Linear head: writes fc(h_{T-1}) of shape (B, O)."""
    h_last = _lstm_recurrence(x_ref, wih_ref, whh_ref, b_ref)
    out_ref[...] = (
        jnp.dot(h_last, fcw_ref[...], preferred_element_type=jnp.float32)
        + fcb_ref[...]
    )


# ---------------------------------------------------------------------------
# Wrappers
# ---------------------------------------------------------------------------
def run_lstm_layer(x, wih_t, whh_t, b):
    B, T, D = x.shape
    H = whh_t.shape[0]
    return pl.pallas_call(
        lstm_layer_kernel,
        out_shape=jax.ShapeDtypeStruct((B, T, H), jnp.float32),
        in_specs=[
            pl.BlockSpec((B, T, D), lambda: (0, 0, 0)),
            pl.BlockSpec((D, 4 * H), lambda: (0, 0)),
            pl.BlockSpec((H, 4 * H), lambda: (0, 0)),
            pl.BlockSpec((1, 4 * H), lambda: (0, 0)),
        ],
        out_specs=pl.BlockSpec((B, T, H), lambda: (0, 0, 0)),
    )(x, wih_t, whh_t, b)


def run_lstm_last_layer_fc(x, wih_t, whh_t, b, fc_w_t, fc_b):
    B, T, D = x.shape
    H = whh_t.shape[0]
    O = fc_w_t.shape[1]
    return pl.pallas_call(
        lstm_last_layer_fc_kernel,
        out_shape=jax.ShapeDtypeStruct((B, O), jnp.float32),
        in_specs=[
            pl.BlockSpec((B, T, D), lambda: (0, 0, 0)),
            pl.BlockSpec((D, 4 * H), lambda: (0, 0)),
            pl.BlockSpec((H, 4 * H), lambda: (0, 0)),
            pl.BlockSpec((1, 4 * H), lambda: (0, 0)),
            pl.BlockSpec((H, O), lambda: (0, 0)),
            pl.BlockSpec((1, O), lambda: (0, 0)),
        ],
        out_specs=pl.BlockSpec((B, O), lambda: (0, 0)),
    )(x, wih_t, whh_t, b, fc_w_t, fc_b)


def lstm_forward(x_btd, params):
    """Full model forward: x (B, T, input_dim) -> (B, output_dim). Batch-first throughout."""
    layers = params["layers"]
    h = x_btd
    for l, (wih_t, whh_t, b) in enumerate(layers):
        if l < len(layers) - 1:
            h = run_lstm_layer(h, wih_t, whh_t, b)          # (B, T, H)
        else:
            return run_lstm_last_layer_fc(h, wih_t, whh_t, b,
                                          params["fc_w_t"], params["fc_b"])


# ---------------------------------------------------------------------------
# Parameters (PyTorch layout) + kernel-format preparation + pure-JAX reference
# ---------------------------------------------------------------------------
def init_raw_params(key, input_dim, hidden_dim, layer_dim, output_dim):
    """PyTorch-style raw params: w_ih (4H,in), w_hh (4H,H), b_ih, b_hh, fc (O,H)."""
    bound = 1.0 / float(hidden_dim) ** 0.5
    layers = []
    for l in range(layer_dim):
        in_dim = input_dim if l == 0 else hidden_dim
        key, k1, k2, k3, k4 = jax.random.split(key, 5)
        w_ih = jax.random.uniform(k1, (4 * hidden_dim, in_dim), jnp.float32, -bound, bound)
        w_hh = jax.random.uniform(k2, (4 * hidden_dim, hidden_dim), jnp.float32, -bound, bound)
        b_ih = jax.random.uniform(k3, (4 * hidden_dim,), jnp.float32, -bound, bound)
        b_hh = jax.random.uniform(k4, (4 * hidden_dim,), jnp.float32, -bound, bound)
        layers.append((w_ih, w_hh, b_ih, b_hh))
    key, k1, k2 = jax.random.split(key, 3)
    fc_w = jax.random.uniform(k1, (output_dim, hidden_dim), jnp.float32, -bound, bound)
    fc_b = jax.random.uniform(k2, (output_dim,), jnp.float32, -bound, bound)
    return {"layers": layers, "fc_w": fc_w, "fc_b": fc_b}


def prepare_params(raw, hidden_dim):
    """Transpose weights for (x @ W) and pre-scale the g gate block by 2
    (so tanh(g) can be computed as 2*sigmoid(2g)-1 from one packed sigmoid)."""
    H = hidden_dim
    scale = jnp.ones((4 * H, 1), jnp.float32).at[2 * H:3 * H].set(2.0)
    layers = []
    for (w_ih, w_hh, b_ih, b_hh) in raw["layers"]:
        layers.append((
            (w_ih * scale).T,                                   # (in, 4H)
            (w_hh * scale).T,                                   # (H, 4H)
            ((b_ih + b_hh) * scale[:, 0]).reshape(1, 4 * H),    # (1, 4H)
        ))
    return {
        "layers": layers,
        "fc_w_t": raw["fc_w"].T,                                # (H, O)
        "fc_b": raw["fc_b"].reshape(1, -1),                     # (1, O)
    }


def reference_forward(x, raw, hidden_dim):
    """Plain-JAX reference with PyTorch nn.LSTM (eval) semantics."""
    H = hidden_dim
    h_seq = x
    for (w_ih, w_hh, b_ih, b_hh) in raw["layers"]:
        B, T, _ = h_seq.shape
        h = jnp.zeros((B, H), jnp.float32)
        c = jnp.zeros((B, H), jnp.float32)
        outs = []
        for t in range(T):
            z = h_seq[:, t, :] @ w_ih.T + b_ih + h @ w_hh.T + b_hh
            i = jax.nn.sigmoid(z[:, 0 * H:1 * H])
            f = jax.nn.sigmoid(z[:, 1 * H:2 * H])
            g = jnp.tanh(z[:, 2 * H:3 * H])
            o = jax.nn.sigmoid(z[:, 3 * H:4 * H])
            c = f * c + i * g
            h = o * jnp.tanh(c)
            outs.append(h)
        h_seq = jnp.stack(outs, axis=1)
    return h_seq[:, -1, :] @ raw["fc_w"].T + raw["fc_b"]


# ---------------------------------------------------------------------------
# Main
# ---------------------------------------------------------------------------
if __name__ == "__main__":
    B, T = 2, 8
    input_dim, hidden_dim, layer_dim, output_dim = 16, 32, 2, 4

    key = jax.random.PRNGKey(0)
    key, kx = jax.random.split(key)
    x = jax.random.normal(kx, (B, T, input_dim), jnp.float32)

    raw = init_raw_params(key, input_dim, hidden_dim, layer_dim, output_dim)
    params = prepare_params(raw, hidden_dim)

    out = jax.block_until_ready(lstm_forward(x, params))
    assert out.shape == (B, output_dim), out.shape

    ref = jax.block_until_ready(reference_forward(x, raw, hidden_dim))
    max_err = float(jnp.max(jnp.abs(out - ref)))
    assert jnp.allclose(out, ref, rtol=2e-3, atol=2e-3), f"max_err={max_err}"

    print("KERNEL_OK")
</pallas_src>

<mosaic_0001>
module attributes {stable_mosaic.version = 11 : i64} {
  func.func @lstm_layer_kernel(%arg0: memref<2x8x16xf32, #tpu.memory_space<vmem>>, %arg1: memref<16x128xf32, #tpu.memory_space<vmem>>, %arg2: memref<32x128xf32, #tpu.memory_space<vmem>>, %arg3: memref<1x128xf32, #tpu.memory_space<vmem>>, %arg4: memref<2x8x32xf32, #tpu.memory_space<vmem>>) attributes {dimension_semantics = [], scalar_prefetch = 0 : i64, scratch_operands = 0 : i64, tpu.core_type = #tpu.core_type<tc>} {
    %c0 = arith.constant 0 : index
    %c0_0 = arith.constant 0 : index
    %0 = vector.load %arg2[%c0, %c0_0] : memref<32x128xf32, #tpu.memory_space<vmem>>, vector<32x128xf32>
    %c0_1 = arith.constant 0 : index
    %c0_2 = arith.constant 0 : index
    %c0_3 = arith.constant 0 : index
    %1 = vector.load %arg0[%c0_1, %c0_2, %c0_3] : memref<2x8x16xf32, #tpu.memory_space<vmem>>, vector<2x8x16xf32>
    %2 = vector.shape_cast %1 : vector<2x8x16xf32> to vector<16x16xf32>
    %c0_4 = arith.constant 0 : index
    %c0_5 = arith.constant 0 : index
    %3 = vector.load %arg1[%c0_4, %c0_5] : memref<16x128xf32, #tpu.memory_space<vmem>>, vector<16x128xf32>
    %cst = arith.constant dense<0.000000e+00> : vector<16x128xf32>
    %4 = tpu.matmul %2, %3, %cst {dimension_numbers = #tpu.dot_dimension_numbers<[1], [0], [0], [1], [0, 0, 1, 1], [], []>} : vector<16x16xf32>, vector<16x128xf32>, vector<16x128xf32> -> vector<16x128xf32>
    %c0_6 = arith.constant 0 : index
    %c0_7 = arith.constant 0 : index
    %5 = vector.load %arg3[%c0_6, %c0_7] : memref<1x128xf32, #tpu.memory_space<vmem>>, vector<1x128xf32>
    %6 = vector.broadcast %5 : vector<1x128xf32> to vector<16x128xf32>
    %7 = arith.addf %4, %6 : vector<16x128xf32>
    %8 = vector.shape_cast %7 : vector<16x128xf32> to vector<2x8x128xf32>
    %cst_8 = arith.constant 0.000000e+00 : f32
    %9 = vector.broadcast %cst_8 : f32 to vector<2x32xf32>
    %cst_9 = arith.constant 0.000000e+00 : f32
    %10 = vector.broadcast %cst_9 : f32 to vector<2x32xf32>
    %11 = vector.extract_strided_slice %8 {offsets = [0, 0, 0], sizes = [2, 1, 128], strides = [1, 1, 1]} : vector<2x8x128xf32> to vector<2x1x128xf32>
    %12 = vector.shape_cast %11 : vector<2x1x128xf32> to vector<2x128xf32>
    %cst_10 = arith.constant dense<0.000000e+00> : vector<2x128xf32>
    %13 = tpu.matmul %9, %0, %cst_10 {dimension_numbers = #tpu.dot_dimension_numbers<[1], [0], [0], [1], [0, 0, 1, 1], [], []>} : vector<2x32xf32>, vector<32x128xf32>, vector<2x128xf32> -> vector<2x128xf32>
    %14 = arith.addf %12, %13 : vector<2x128xf32>
    %15 = arith.negf %14 : vector<2x128xf32>
    %16 = math.exp %15 : vector<2x128xf32>
    %cst_11 = arith.constant 1.000000e+00 : f32
    %17 = vector.broadcast %cst_11 : f32 to vector<2x128xf32>
    %18 = arith.addf %17, %16 : vector<2x128xf32>
    %19 = arith.divf %17, %18 : vector<2x128xf32>
    %20 = vector.extract_strided_slice %19 {offsets = [0, 0], sizes = [2, 32], strides = [1, 1]} : vector<2x128xf32> to vector<2x32xf32>
    %21 = vector.extract_strided_slice %19 {offsets = [0, 32], sizes = [2, 32], strides = [1, 1]} : vector<2x128xf32> to vector<2x32xf32>
    %22 = vector.extract_strided_slice %19 {offsets = [0, 64], sizes = [2, 32], strides = [1, 1]} : vector<2x128xf32> to vector<2x32xf32>
    %cst_12 = arith.constant 2.000000e+00 : f32
    %23 = vector.broadcast %cst_12 : f32 to vector<2x32xf32>
    %24 = arith.mulf %23, %22 : vector<2x32xf32>
    %cst_13 = arith.constant 1.000000e+00 : f32
    %25 = vector.broadcast %cst_13 : f32 to vector<2x32xf32>
    %26 = arith.subf %24, %25 : vector<2x32xf32>
    %27 = vector.extract_strided_slice %19 {offsets = [0, 96], sizes = [2, 32], strides = [1, 1]} : vector<2x128xf32> to vector<2x32xf32>
    %28 = arith.mulf %21, %10 : vector<2x32xf32>
    %29 = arith.mulf %20, %26 : vector<2x32xf32>
    %30 = arith.addf %28, %29 : vector<2x32xf32>
    %31 = math.tanh %30 : vector<2x32xf32>
    %32 = arith.mulf %27, %31 : vector<2x32xf32>
    %33 = vector.shape_cast %32 : vector<2x32xf32> to vector<2x1x32xf32>
    %c0_14 = arith.constant 0 : index
    %c0_15 = arith.constant 0 : index
    %c0_16 = arith.constant 0 : index
    %34 = vector.load %arg4[%c0_14, %c0_15, %c0_16] : memref<2x8x32xf32, #tpu.memory_space<vmem>>, vector<2x1x32xf32>
    tpu.vector_store %arg4[%c0_14, %c0_15, %c0_16], %33 {strides = array<i32>} : memref<2x8x32xf32, #tpu.memory_space<vmem>>, vector<2x1x32xf32>,
    %35 = vector.extract_strided_slice %8 {offsets = [0, 1, 0], sizes = [2, 1, 128], strides = [1, 1, 1]} : vector<2x8x128xf32> to vector<2x1x128xf32>
    %36 = vector.shape_cast %35 : vector<2x1x128xf32> to vector<2x128xf32>
    %cst_17 = arith.constant dense<0.000000e+00> : vector<2x128xf32>
    %37 = tpu.matmul %32, %0, %cst_17 {dimension_numbers = #tpu.dot_dimension_numbers<[1], [0], [0], [1], [0, 0, 1, 1], [], []>} : vector<2x32xf32>, vector<32x128xf32>, vector<2x128xf32> -> vector<2x128xf32>
    %38 = arith.addf %36, %37 : vector<2x128xf32>
    %39 = arith.negf %38 : vector<2x128xf32>
    %40 = math.exp %39 : vector<2x128xf32>
    %cst_18 = arith.constant 1.000000e+00 : f32
    %41 = vector.broadcast %cst_18 : f32 to vector<2x128xf32>
    %42 = arith.addf %41, %40 : vector<2x128xf32>
    %43 = arith.divf %41, %42 : vector<2x128xf32>
    %44 = vector.extract_strided_slice %43 {offsets = [0, 0], sizes = [2, 32], strides = [1, 1]} : vector<2x128xf32> to vector<2x32xf32>
    %45 = vector.extract_strided_slice %43 {offsets = [0, 32], sizes = [2, 32], strides = [1, 1]} : vector<2x128xf32> to vector<2x32xf32>
    %46 = vector.extract_strided_slice %43 {offsets = [0, 64], sizes = [2, 32], strides = [1, 1]} : vector<2x128xf32> to vector<2x32xf32>
    %cst_19 = arith.constant 2.000000e+00 : f32
    %47 = vector.broadcast %cst_19 : f32 to vector<2x32xf32>
    %48 = arith.mulf %47, %46 : vector<2x32xf32>
    %cst_20 = arith.constant 1.000000e+00 : f32
    %49 = vector.broadcast %cst_20 : f32 to vector<2x32xf32>
    %50 = arith.subf %48, %49 : vector<2x32xf32>
    %51 = vector.extract_strided_slice %43 {offsets = [0, 96], sizes = [2, 32], strides = [1, 1]} : vector<2x128xf32> to vector<2x32xf32>
    %52 = arith.mulf %45, %30 : vector<2x32xf32>
    %53 = arith.mulf %44, %50 : vector<2x32xf32>
    %54 = arith.addf %52, %53 : vector<2x32xf32>
    %55 = math.tanh %54 : vector<2x32xf32>
    %56 = arith.mulf %51, %55 : vector<2x32xf32>
    %57 = vector.shape_cast %56 : vector<2x32xf32> to vector<2x1x32xf32>
    %c0_21 = arith.constant 0 : index
    %c1 = arith.constant 1 : index
    %c0_22 = arith.constant 0 : index
    %58 = vector.load %arg4[%c0_21, %c1, %c0_22] : memref<2x8x32xf32, #tpu.memory_space<vmem>>, vector<2x1x32xf32>
    tpu.vector_store %arg4[%c0_21, %c1, %c0_22], %57 {strides = array<i32>} : memref<2x8x32xf32, #tpu.memory_space<vmem>>, vector<2x1x32xf32>,
    %59 = vector.extract_strided_slice %8 {offsets = [0, 2, 0], sizes = [2, 1, 128], strides = [1, 1, 1]} : vector<2x8x128xf32> to vector<2x1x128xf32>
    %60 = vector.shape_cast %59 : vector<2x1x128xf32> to vector<2x128xf32>
    %cst_23 = arith.constant dense<0.000000e+00> : vector<2x128xf32>
    %61 = tpu.matmul %56, %0, %cst_23 {dimension_numbers = #tpu.dot_dimension_numbers<[1], [0], [0], [1], [0, 0, 1, 1], [], []>} : vector<2x32xf32>, vector<32x128xf32>, vector<2x128xf32> -> vector<2x128xf32>
    %62 = arith.addf %60, %61 : vector<2x128xf32>
    %63 = arith.negf %62 : vector<2x128xf32>
    %64 = math.exp %63 : vector<2x128xf32>
    %cst_24 = arith.constant 1.000000e+00 : f32
    %65 = vector.broadcast %cst_24 : f32 to vector<2x128xf32>
    %66 = arith.addf %65, %64 : vector<2x128xf32>
    %67 = arith.divf %65, %66 : vector<2x128xf32>
    %68 = vector.extract_strided_slice %67 {offsets = [0, 0], sizes = [2, 32], strides = [1, 1]} : vector<2x128xf32> to vector<2x32xf32>
    %69 = vector.extract_strided_slice %67 {offsets = [0, 32], sizes = [2, 32], strides = [1, 1]} : vector<2x128xf32> to vector<2x32xf32>
    %70 = vector.extract_strided_slice %67 {offsets = [0, 64], sizes = [2, 32], strides = [1, 1]} : vector<2x128xf32> to vector<2x32xf32>
    %cst_25 = arith.constant 2.000000e+00 : f32
    %71 = vector.broadcast %cst_25 : f32 to vector<2x32xf32>
    %72 = arith.mulf %71, %70 : vector<2x32xf32>
    %cst_26 = arith.constant 1.000000e+00 : f32
    %73 = vector.broadcast %cst_26 : f32 to vector<2x32xf32>
    %74 = arith.subf %72, %73 : vector<2x32xf32>
    %75 = vector.extract_strided_slice %67 {offsets = [0, 96], sizes = [2, 32], strides = [1, 1]} : vector<2x128xf32> to vector<2x32xf32>
    %76 = arith.mulf %69, %54 : vector<2x32xf32>
    %77 = arith.mulf %68, %74 : vector<2x32xf32>
    %78 = arith.addf %76, %77 : vector<2x32xf32>
    %79 = math.tanh %78 : vector<2x32xf32>
    %80 = arith.mulf %75, %79 : vector<2x32xf32>
    %81 = vector.shape_cast %80 : vector<2x32xf32> to vector<2x1x32xf32>
    %c0_27 = arith.constant 0 : index
    %c2 = arith.constant 2 : index
    %c0_28 = arith.constant 0 : index
    %82 = vector.load %arg4[%c0_27, %c2, %c0_28] : memref<2x8x32xf32, #tpu.memory_space<vmem>>, vector<2x1x32xf32>
    tpu.vector_store %arg4[%c0_27, %c2, %c0_28], %81 {strides = array<i32>} : memref<2x8x32xf32, #tpu.memory_space<vmem>>, vector<2x1x32xf32>,
    %83 = vector.extract_strided_slice %8 {offsets = [0, 3, 0], sizes = [2, 1, 128], strides = [1, 1, 1]} : vector<2x8x128xf32> to vector<2x1x128xf32>
    %84 = vector.shape_cast %83 : vector<2x1x128xf32> to vector<2x128xf32>
    %cst_29 = arith.constant dense<0.000000e+00> : vector<2x128xf32>
    %85 = tpu.matmul %80, %0, %cst_29 {dimension_numbers = #tpu.dot_dimension_numbers<[1], [0], [0], [1], [0, 0, 1, 1], [], []>} : vector<2x32xf32>, vector<32x128xf32>, vector<2x128xf32> -> vector<2x128xf32>
    %86 = arith.addf %84, %85 : vector<2x128xf32>
    %87 = arith.negf %86 : vector<2x128xf32>
    %88 = math.exp %87 : vector<2x128xf32>
    %cst_30 = arith.constant 1.000000e+00 : f32
    %89 = vector.broadcast %cst_30 : f32 to vector<2x128xf32>
    %90 = arith.addf %89, %88 : vector<2x128xf32>
    %91 = arith.divf %89, %90 : vector<2x128xf32>
    %92 = vector.extract_strided_slice %91 {offsets = [0, 0], sizes = [2, 32], strides = [1, 1]} : vector<2x128xf32> to vector<2x32xf32>
    %93 = vector.extract_strided_slice %91 {offsets = [0, 32], sizes = [2, 32], strides = [1, 1]} : vector<2x128xf32> to vector<2x32xf32>
    %94 = vector.extract_strided_slice %91 {offsets = [0, 64], sizes = [2, 32], strides = [1, 1]} : vector<2x128xf32> to vector<2x32xf32>
    %cst_31 = arith.constant 2.000000e+00 : f32
    %95 = vector.broadcast %cst_31 : f32 to vector<2x32xf32>
    %96 = arith.mulf %95, %94 : vector<2x32xf32>
    %cst_32 = arith.constant 1.000000e+00 : f32
    %97 = vector.broadcast %cst_32 : f32 to vector<2x32xf32>
    %98 = arith.subf %96, %97 : vector<2x32xf32>
    %99 = vector.extract_strided_slice %91 {offsets = [0, 96], sizes = [2, 32], strides = [1, 1]} : vector<2x128xf32> to vector<2x32xf32>
    %100 = arith.mulf %93, %78 : vector<2x32xf32>
    %101 = arith.mulf %92, %98 : vector<2x32xf32>
    %102 = arith.addf %100, %101 : vector<2x32xf32>
    %103 = math.tanh %102 : vector<2x32xf32>
    %104 = arith.mulf %99, %103 : vector<2x32xf32>
    %105 = vector.shape_cast %104 : vector<2x32xf32> to vector<2x1x32xf32>
    %c0_33 = arith.constant 0 : index
    %c3 = arith.constant 3 : index
    %c0_34 = arith.constant 0 : index
    %106 = vector.load %arg4[%c0_33, %c3, %c0_34] : memref<2x8x32xf32, #tpu.memory_space<vmem>>, vector<2x1x32xf32>
    tpu.vector_store %arg4[%c0_33, %c3, %c0_34], %105 {strides = array<i32>} : memref<2x8x32xf32, #tpu.memory_space<vmem>>, vector<2x1x32xf32>,
    %107 = vector.extract_strided_slice %8 {offsets = [0, 4, 0], sizes = [2, 1, 128], strides = [1, 1, 1]} : vector<2x8x128xf32> to vector<2x1x128xf32>
    %108 = vector.shape_cast %107 : vector<2x1x128xf32> to vector<2x128xf32>
    %cst_35 = arith.constant dense<0.000000e+00> : vector<2x128xf32>
    %109 = tpu.matmul %104, %0, %cst_35 {dimension_numbers = #tpu.dot_dimension_numbers<[1], [0], [0], [1], [0, 0, 1, 1], [], []>} : vector<2x32xf32>, vector<32x128xf32>, vector<2x128xf32> -> vector<2x128xf32>
    %110 = arith.addf %108, %109 : vector<2x128xf32>
    %111 = arith.negf %110 : vector<2x128xf32>
    %112 = math.exp %111 : vector<2x128xf32>
    %cst_36 = arith.constant 1.000000e+00 : f32
    %113 = vector.broadcast %cst_36 : f32 to vector<2x128xf32>
    %114 = arith.addf %113, %112 : vector<2x128xf32>
    %115 = arith.divf %113, %114 : vector<2x128xf32>
    %116 = vector.extract_strided_slice %115 {offsets = [0, 0], sizes = [2, 32], strides = [1, 1]} : vector<2x128xf32> to vector<2x32xf32>
    %117 = vector.extract_strided_slice %115 {offsets = [0, 32], sizes = [2, 32], strides = [1, 1]} : vector<2x128xf32> to vector<2x32xf32>
    %118 = vector.extract_strided_slice %115 {offsets = [0, 64], sizes = [2, 32], strides = [1, 1]} : vector<2x128xf32> to vector<2x32xf32>
    %cst_37 = arith.constant 2.000000e+00 : f32
    %119 = vector.broadcast %cst_37 : f32 to vector<2x32xf32>
    %120 = arith.mulf %119, %118 : vector<2x32xf32>
    %cst_38 = arith.constant 1.000000e+00 : f32
    %121 = vector.broadcast %cst_38 : f32 to vector<2x32xf32>
    %122 = arith.subf %120, %121 : vector<2x32xf32>
    %123 = vector.extract_strided_slice %115 {offsets = [0, 96], sizes = [2, 32], strides = [1, 1]} : vector<2x128xf32> to vector<2x32xf32>
    %124 = arith.mulf %117, %102 : vector<2x32xf32>
    %125 = arith.mulf %116, %122 : vector<2x32xf32>
    %126 = arith.addf %124, %125 : vector<2x32xf32>
    %127 = math.tanh %126 : vector<2x32xf32>
    %128 = arith.mulf %123, %127 : vector<2x32xf32>
    %129 = vector.shape_cast %128 : vector<2x32xf32> to vector<2x1x32xf32>
    %c0_39 = arith.constant 0 : index
    %c4 = arith.constant 4 : index
    %c0_40 = arith.constant 0 : index
    %130 = vector.load %arg4[%c0_39, %c4, %c0_40] : memref<2x8x32xf32, #tpu.memory_space<vmem>>, vector<2x1x32xf32>
    tpu.vector_store %arg4[%c0_39, %c4, %c0_40], %129 {strides = array<i32>} : memref<2x8x32xf32, #tpu.memory_space<vmem>>, vector<2x1x32xf32>,
    %131 = vector.extract_strided_slice %8 {offsets = [0, 5, 0], sizes = [2, 1, 128], strides = [1, 1, 1]} : vector<2x8x128xf32> to vector<2x1x128xf32>
    %132 = vector.shape_cast %131 : vector<2x1x128xf32> to vector<2x128xf32>
    %cst_41 = arith.constant dense<0.000000e+00> : vector<2x128xf32>
    %133 = tpu.matmul %128, %0, %cst_41 {dimension_numbers = #tpu.dot_dimension_numbers<[1], [0], [0], [1], [0, 0, 1, 1], [], []>} : vector<2x32xf32>, vector<32x128xf32>, vector<2x128xf32> -> vector<2x128xf32>
    %134 = arith.addf %132, %133 : vector<2x128xf32>
    %135 = arith.negf %134 : vector<2x128xf32>
    %136 = math.exp %135 : vector<2x128xf32>
    %cst_42 = arith.constant 1.000000e+00 : f32
    %137 = vector.broadcast %cst_42 : f32 to vector<2x128xf32>
    %138 = arith.addf %137, %136 : vector<2x128xf32>
    %139 = arith.divf %137, %138 : vector<2x128xf32>
    %140 = vector.extract_strided_slice %139 {offsets = [0, 0], sizes = [2, 32], strides = [1, 1]} : vector<2x128xf32> to vector<2x32xf32>
    %141 = vector.extract_strided_slice %139 {offsets = [0, 32], sizes = [2, 32], strides = [1, 1]} : vector<2x128xf32> to vector<2x32xf32>
    %142 = vector.extract_strided_slice %139 {offsets = [0, 64], sizes = [2, 32], strides = [1, 1]} : vector<2x128xf32> to vector<2x32xf32>
    %cst_43 = arith.constant 2.000000e+00 : f32
    %143 = vector.broadcast %cst_43 : f32 to vector<2x32xf32>
    %144 = arith.mulf %143, %142 : vector<2x32xf32>
    %cst_44 = arith.constant 1.000000e+00 : f32
    %145 = vector.broadcast %cst_44 : f32 to vector<2x32xf32>
    %146 = arith.subf %144, %145 : vector<2x32xf32>
    %147 = vector.extract_strided_slice %139 {offsets = [0, 96], sizes = [2, 32], strides = [1, 1]} : vector<2x128xf32> to vector<2x32xf32>
    %148 = arith.mulf %141, %126 : vector<2x32xf32>
    %149 = arith.mulf %140, %146 : vector<2x32xf32>
    %150 = arith.addf %148, %149 : vector<2x32xf32>
    %151 = math.tanh %150 : vector<2x32xf32>
    %152 = arith.mulf %147, %151 : vector<2x32xf32>
    %153 = vector.shape_cast %152 : vector<2x32xf32> to vector<2x1x32xf32>
    %c0_45 = arith.constant 0 : index
    %c5 = arith.constant 5 : index
    %c0_46 = arith.constant 0 : index
    %154 = vector.load %arg4[%c0_45, %c5, %c0_46] : memref<2x8x32xf32, #tpu.memory_space<vmem>>, vector<2x1x32xf32>
    tpu.vector_store %arg4[%c0_45, %c5, %c0_46], %153 {strides = array<i32>} : memref<2x8x32xf32, #tpu.memory_space<vmem>>, vector<2x1x32xf32>,
    %155 = vector.extract_strided_slice %8 {offsets = [0, 6, 0], sizes = [2, 1, 128], strides = [1, 1, 1]} : vector<2x8x128xf32> to vector<2x1x128xf32>
    %156 = vector.shape_cast %155 : vector<2x1x128xf32> to vector<2x128xf32>
    %cst_47 = arith.constant dense<0.000000e+00> : vector<2x128xf32>
    %157 = tpu.matmul %152, %0, %cst_47 {dimension_numbers = #tpu.dot_dimension_numbers<[1], [0], [0], [1], [0, 0, 1, 1], [], []>} : vector<2x32xf32>, vector<32x128xf32>, vector<2x128xf32> -> vector<2x128xf32>
    %158 = arith.addf %156, %157 : vector<2x128xf32>
    %159 = arith.negf %158 : vector<2x128xf32>
    %160 = math.exp %159 : vector<2x128xf32>
    %cst_48 = arith.constant 1.000000e+00 : f32
    %161 = vector.broadcast %cst_48 : f32 to vector<2x128xf32>
    %162 = arith.addf %161, %160 : vector<2x128xf32>
    %163 = arith.divf %161, %162 : vector<2x128xf32>
    %164 = vector.extract_strided_slice %163 {offsets = [0, 0], sizes = [2, 32], strides = [1, 1]} : vector<2x128xf32> to vector<2x32xf32>
    %165 = vector.extract_strided_slice %163 {offsets = [0, 32], sizes = [2, 32], strides = [1, 1]} : vector<2x128xf32> to vector<2x32xf32>
    %166 = vector.extract_strided_slice %163 {offsets = [0, 64], sizes = [2, 32], strides = [1, 1]} : vector<2x128xf32> to vector<2x32xf32>
    %cst_49 = arith.constant 2.000000e+00 : f32
    %167 = vector.broadcast %cst_49 : f32 to vector<2x32xf32>
    %168 = arith.mulf %167, %166 : vector<2x32xf32>
    %cst_50 = arith.constant 1.000000e+00 : f32
    %169 = vector.broadcast %cst_50 : f32 to vector<2x32xf32>
    %170 = arith.subf %168, %169 : vector<2x32xf32>
    %171 = vector.extract_strided_slice %163 {offsets = [0, 96], sizes = [2, 32], strides = [1, 1]} : vector<2x128xf32> to vector<2x32xf32>
    %172 = arith.mulf %165, %150 : vector<2x32xf32>
    %173 = arith.mulf %164, %170 : vector<2x32xf32>
    %174 = arith.addf %172, %173 : vector<2x32xf32>
    %175 = math.tanh %174 : vector<2x32xf32>
    %176 = arith.mulf %171, %175 : vector<2x32xf32>
    %177 = vector.shape_cast %176 : vector<2x32xf32> to vector<2x1x32xf32>
    %c0_51 = arith.constant 0 : index
    %c6 = arith.constant 6 : index
    %c0_52 = arith.constant 0 : index
    %178 = vector.load %arg4[%c0_51, %c6, %c0_52] : memref<2x8x32xf32, #tpu.memory_space<vmem>>, vector<2x1x32xf32>
    tpu.vector_store %arg4[%c0_51, %c6, %c0_52], %177 {strides = array<i32>} : memref<2x8x32xf32, #tpu.memory_space<vmem>>, vector<2x1x32xf32>,
    %179 = vector.extract_strided_slice %8 {offsets = [0, 7, 0], sizes = [2, 1, 128], strides = [1, 1, 1]} : vector<2x8x128xf32> to vector<2x1x128xf32>
    %180 = vector.shape_cast %179 : vector<2x1x128xf32> to vector<2x128xf32>
    %cst_53 = arith.constant dense<0.000000e+00> : vector<2x128xf32>
    %181 = tpu.matmul %176, %0, %cst_53 {dimension_numbers = #tpu.dot_dimension_numbers<[1], [0], [0], [1], [0, 0, 1, 1], [], []>} : vector<2x32xf32>, vector<32x128xf32>, vector<2x128xf32> -> vector<2x128xf32>
    %182 = arith.addf %180, %181 : vector<2x128xf32>
    %183 = arith.negf %182 : vector<2x128xf32>
    %184 = math.exp %183 : vector<2x128xf32>
    %cst_54 = arith.constant 1.000000e+00 : f32
    %185 = vector.broadcast %cst_54 : f32 to vector<2x128xf32>
    %186 = arith.addf %185, %184 : vector<2x128xf32>
    %187 = arith.divf %185, %186 : vector<2x128xf32>
    %188 = vector.extract_strided_slice %187 {offsets = [0, 0], sizes = [2, 32], strides = [1, 1]} : vector<2x128xf32> to vector<2x32xf32>
    %189 = vector.extract_strided_slice %187 {offsets = [0, 32], sizes = [2, 32], strides = [1, 1]} : vector<2x128xf32> to vector<2x32xf32>
    %190 = vector.extract_strided_slice %187 {offsets = [0, 64], sizes = [2, 32], strides = [1, 1]} : vector<2x128xf32> to vector<2x32xf32>
    %cst_55 = arith.constant 2.000000e+00 : f32
    %191 = vector.broadcast %cst_55 : f32 to vector<2x32xf32>
    %192 = arith.mulf %191, %190 : vector<2x32xf32>
    %cst_56 = arith.constant 1.000000e+00 : f32
    %193 = vector.broadcast %cst_56 : f32 to vector<2x32xf32>
    %194 = arith.subf %192, %193 : vector<2x32xf32>
    %195 = vector.extract_strided_slice %187 {offsets = [0, 96], sizes = [2, 32], strides = [1, 1]} : vector<2x128xf32> to vector<2x32xf32>
    %196 = arith.mulf %189, %174 : vector<2x32xf32>
    %197 = arith.mulf %188, %194 : vector<2x32xf32>
    %198 = arith.addf %196, %197 : vector<2x32xf32>
    %199 = math.tanh %198 : vector<2x32xf32>
    %200 = arith.mulf %195, %199 : vector<2x32xf32>
    %201 = vector.shape_cast %200 : vector<2x32xf32> to vector<2x1x32xf32>
    %c0_57 = arith.constant 0 : index
    %c7 = arith.constant 7 : index
    %c0_58 = arith.constant 0 : index
    %202 = vector.load %arg4[%c0_57, %c7, %c0_58] : memref<2x8x32xf32, #tpu.memory_space<vmem>>, vector<2x1x32xf32>
    tpu.vector_store %arg4[%c0_57, %c7, %c0_58], %201 {strides = array<i32>} : memref<2x8x32xf32, #tpu.memory_space<vmem>>, vector<2x1x32xf32>,
    return
  }
}

</mosaic_0001>

<bundles_post_ra>
// kernel: tpu_custom_call.1
= control target key start
LH: loop header
LB: loop body
LE: loop exit
PB: predicated region body
PF: predicated region fallthrough
CT: control target
= control target key end

     0   :  { %9 = vsyncpa [#allocation3], 0  ;;  %s2126_s0 = inlined_call_operand.hbm [shape: f32[2,8,16], index: 0, kind: input, shape index: {}]   ;;  %s2127_s1 = inlined_call_operand.hbm [shape: f32[16,128], index: 1, kind: input, shape index: {}]   ;;  %s2128_s2 = inlined_call_operand.hbm [shape: f32[32,128], index: 2, kind: input, shape index: {}]   ;;  %s2129_s3 = inlined_call_operand.vmem [shape: f32[1,128], index: 3, kind: input, shape index: {}]   ;;  %s2130_s4 = inlined_call_operand.hbm [shape: f32[2,8,32], index: 4, kind: output, shape index: {}]  }
   0x1   :  { %10 = vsyncpa [#allocation6], 0 }
   0x2   :  { %11 = vsyncpa [#allocation4], 0  ;;  %s1804_s15 = smov [#allocation5]   ;;  %s1805_s17 = smov [#allocation2]  }
   0x3   :  { %s29_s16 = sshll.u32 %s1804_s15, 4  ;;  %s17_s18 = sshll.u32 %s1805_s17, 4  ;;  %s30_s16 = int_to_ptr.vmem [resolvable:$true] %s29_s16  ;;  %s1840_s18 = int_to_ptr.vmem [resolvable:$true] %s17_s18 }
   0x4   :  { %s1710_s21 = scalar_lea.hbm %s2127_s1, 256 }
   0x5   :  { %p1711_p0 = scmp.ne.s32.totalorder %s2127_s1, %s1710_s21  ;;  %p1714_p1 = scmp.lt.u32.totalorder %s1710_s21, %s2127_s1 }
   0x7   :  { %p1716_p2 = pnand %p1714_p1, %p1711_p0 }
   0x9   :  { %1719 = shalt.err (!%p1716_p2)
}
   0xa   :  { %s1720_s26 = scalar_lea.vmem %s30_s16, 256  ;;  %p1725_p4 = scmp.lt.s32.totalorder %s30_s16, %s30_s16 }
   0xb   :  { %p1721_p3 = scmp.ne.s32.totalorder %s30_s16, %s1720_s26  ;;  %p1726_p5 = scmp.lt.s32.totalorder %s1720_s26, %s1720_s26 }
   0xd   :  { %p1727_p6 = por %p1726_p5, %p1725_p4 }
   0xf   :  { %p1728_p7 = pnand %p1727_p6, %p1721_p3 }
  0x11   :  { %1731 = shalt.err (!%p1728_p7)
}
  0x12   :  { %s1806_s27 = smov 128   ;;  %s1807_s28 = smov 8  }
  0x13   :  { %35 = dma.hbm_to_vmem [thread:$0]  %s2127_s1, 256, %s30_s16, [#allocation6], %s1806_s27, %s1806_s27, %s1807_s28  }
  0x14   :  { %s1732_s7 = scalar_lea.hbm %s2126_s0, 256 }
  0x15   :  { %p1733_p8 = scmp.ne.s32.totalorder %s2126_s0, %s1732_s7  ;;  %p1736_p9 = scmp.lt.u32.totalorder %s1732_s7, %s2126_s0 }
  0x17   :  { %p1738_p10 = pnand %p1736_p9, %p1733_p8 }
  0x19   :  { %1741 = shalt.err (!%p1738_p10)
}
  0x1a   :  { %s1742_s12 = scalar_lea.vmem %s1840_s18, 256  ;;  %p1747_p12 = scmp.lt.s32.totalorder %s1840_s18, %s1840_s18 }
  0x1b   :  { %p1743_p11 = scmp.ne.s32.totalorder %s1840_s18, %s1742_s12  ;;  %p1748_p13 = scmp.lt.s32.totalorder %s1742_s12, %s1742_s12 }
  0x1d   :  { %p1749_p0 = por %p1748_p13, %p1747_p12 }
  0x1f   :  { %p1750_p1 = pnand %p1749_p0, %p1743_p11 }
  0x21   :  { %1753 = shalt.err (!%p1750_p1)
}
  0x22   :  { %23 = dma.hbm_to_vmem [thread:$0]  %s2126_s0, 256, %s1840_s18, [#allocation3], %s1806_s27, %s1806_s27, %s1807_s28  }
  0x23   :  { %s1808_s14 = smov [#allocation7]   ;;  %s1754_s19 = scalar_lea.hbm %s2128_s2, 512 }
  0x24   :  { %s41_s15 = sshll.u32 %s1808_s14, 4  ;;  %p1755_p2 = scmp.ne.s32.totalorder %s2128_s2, %s1754_s19  ;;  %s42_s15 = int_to_ptr.vmem [resolvable:$true] %s41_s15 }
  0x25   :  { %p1758_p3 = scmp.lt.u32.totalorder %s1754_s19, %s2128_s2 }
  0x27   :  { %p1760_p4 = pnand %p1758_p3, %p1755_p2 }
  0x29   :  { %1763 = shalt.err (!%p1760_p4)
}
  0x2a   :  { %s1764_s24 = scalar_lea.vmem %s42_s15, 512  ;;  %p1769_p6 = scmp.lt.s32.totalorder %s42_s15, %s42_s15 }
  0x2b   :  { %p1765_p5 = scmp.ne.s32.totalorder %s42_s15, %s1764_s24  ;;  %p1770_p7 = scmp.lt.s32.totalorder %s1764_s24, %s1764_s24 }
  0x2d   :  { %p1771_p8 = por %p1770_p7, %p1769_p6 }
  0x2f   :  { %p1772_p9 = pnand %p1771_p8, %p1765_p5 }
  0x31   :  { %1775 = shalt.err (!%p1772_p9)
}
  0x32   :  { %47 = dma.hbm_to_vmem [thread:$0]  %s2128_s2, 512, %s42_s15, [#allocation6], %s1806_s27, %s1806_s27, %s1807_s28  }
  0x33   :  { %1798 = dma.done.wait [#allocation3], 256  }
  0x34   :  { %1799 = vsyncadd [#allocation3], 4294967040 }
  0x35   :  { %1800 = dma.done.wait [#allocation6], 768  }
  0x36   :  { %1801 = vsyncadd [#allocation6], 4294966528  ;;  %v1809_v0 = vmov 0.0|0.0   ;;  %vm1810_vm0 = vmmov 0   ;;  %v1811_v1 = vmov 0.0   ;;  %vm74_vm1 = vcmask 130048  }
  0x37   :  { %1555 = vmatprep.subr.bf16.mxu1 %v1809_v0  ;;  %1471 = vmatprep.mubr.msk.f32.mxu1 %vm1810_vm0, %v1811_v1  ;;  %v65_v2 = vld [vmem:[#allocation5] sm:$0xff]  ;;  %v66_v3 = vld [vmem:[#allocation5 + $0x8] sm:$0xff]  ;;  %v59_v4 = vld [vmem:[#allocation7] sm:$0xff]  ;;  %s1813_s26 = smov 32   ;;  %vm298_vm2 = vcmask 1041409   ;;  %vm156_vm3 = vcmask 261120  }
  0x38   :  { %v1551_v5 = vpack.c.bf16 %v66_v3, %v65_v2  ;;  %v60_v6 = vld [vmem:[#allocation7 + $0x8] sm:$0xff]  ;;  %v63_v7 = vld [vmem:[#allocation2] sm:$0xff]  ;;  %v61_v9 = vld [vmem:[#allocation7 + $0x10] sm:$0xff]  ;;  %vm294_vm4 = vcmask 253952   ;;  %vm444_vm5 = vcmask 254977   ;;  %vm594_vm6 = vcmask 256002  }
  0x39   :  { %v1895_v8 = vpack.c.bf16 %v60_v6, %v59_v4  ;;  %1460 = vmatprep.mubr.msk.f32.mxu0 %vm74_vm1, %v63_v7  ;;  %v62_v10 = vld [vmem:[#allocation7 + $0x18] sm:$0xff]  ;;  %v64_v11 = vld [vmem:[#allocation2 + $0x8] sm:$0xff]  ;;  %v1370_v13 = vld [vmem:[%s2129_s3] ss:$0 sm:$0xff]  ;;  %s1812_s3 = smov 64   ;;  %vm745_vm7 = vcmask 257027  }
  0x3a   :  { %1552 = vmatprep.subr.bf16.mxu0 %v1551_v5  ;;  %v1899_v12 = vpack.c.bf16 %v62_v10, %v61_v9  ;;  %vm896_vm8 = vcmask 258052   ;;  %vm1047_vm9 = vcmask 259077   ;;  %vm1198_vm10 = vcmask 260102   ;;  %s1814_s29 = smov [#allocation8]  }
  0x3b   :  { %1557 = vmatpush3.bf16.msra.mxu1 %v1895_v8  ;;  %1554 = vmatpush3.bf16.msra.mxu0 %v1551_v5  ;;  %s1357_s30 = sshll.u32 %s1814_s29, 4  ;;  %vm1349_vm11 = vcmask 261127   ;;  %s1358_s30 = int_to_ptr.vmem [resolvable:$true] %s1357_s30 }
  0x3c   :  { %1558 = vmatprep.subr.bf16.mxu1 %v1809_v0  ;;  %1561 = vmatprep.subr.bf16.mxu0 %v1809_v0  ;;  %s1776_s5 = scalar_lea.vmem %s1358_s30, 256  ;;  %p1781_p11 = scmp.lt.s32.totalorder %s1358_s30, %s1358_s30 }
  0x3d   :  { %p1777_p10 = scmp.ne.s32.totalorder %s1358_s30, %s1776_s5  ;;  %p1782_p12 = scmp.lt.s32.totalorder %s1776_s5, %s1776_s5 }
  0x3e   :  { %1461 = vmatmul.mubr.msk.f32.vlgmr.msra.gmra.mrb[0].mxu0 %vm74_vm1, %v64_v11 }
  0x3f   :  { %1560 = vmatpush3.bf16.msra.mxu1 %v1899_v12  ;;  %1563 = vmatpush3.bf16.msra.mxu0 %v1895_v8  ;;  %p1783_p13 = por %p1782_p12, %p1781_p11 }
  0x40   :  { %1564 = vmatprep.subr.bf16.mxu0 %v1809_v0  ;;  %1482 = vmatprep.mubr.msk.f32.mxu0 %vm1810_vm0, %v1811_v1 }
  0x41   :  { %1567 = vmatprep.subr.bf16.mxu1 %v1809_v0  ;;  %p1784_p0 = pnand %p1783_p13, %p1777_p10 }
  0x42   :  { %1472 = vmatmul.mubr.f32.vlgmr.msra.gmra.mrb[0].mxu1 %v1811_v1 }
  0x43   :  { %1566 = vmatpush3.bf16.msra.mxu0 %v1899_v12  ;;  %1569 = vmatpush3.bf16.msra.mxu1 %v1895_v8 }
  0x44   :  { %1570 = vmatprep.subr.bf16.mxu1 %v1809_v0  ;;  %1493 = vmatprep.mubr.msk.f32.mxu1 %vm1810_vm0, %v1811_v1 }
  0x45   :  { %1573 = vmatprep.subr.bf16.mxu0 %v1809_v0 }
  0x47   :  { %1572 = vmatpush3.bf16.msra.mxu1 %v1899_v12 }
  0x48   :  { %1579 = vmatprep.subr.bf16.mxu1 %v1809_v0 }
 0x111   :  { %v1462_v14 = vpop.f32.mrb[0].mxu0 }
 0x112   :  { %v147_v15 = vpop.f32.mrb[1].mxu0  ;;  %v1924_v17 = vadd.f32 %v1462_v14, %v1370_v13 }
 0x113   :  { %v1922_v16 = vadd.f32 %v1370_v13, %v147_v15 }
 0x115   :  { %v226_v18 = vpop.f32.mrb[0].mxu1 }
 0x116   :  { %v231_v19 = vrot.slane %v226_v18, 1  ;;  %v234_v20 = vadd.f32 %v226_v18, %v1922_v16  ;;  %v1473_v21 = vpop.f32.mrb[1].mxu1 }
 0x118   :  { %v235_v22 = vadd.f32 %v231_v19, %v1924_v17  ;;  %v1373_v23 = vmul.f32 -1.442695, %v234_v20 }
 0x11a   :  { %1614 = vpow2.f32 %v1373_v23  ;;  %v1374_v24 = vmul.f32 -1.442695, %v235_v22 }
 0x11c   :  { %1616 = vpow2.f32 %v1374_v24 }
 0x124   :  { %v1615_v25 = vpop.eup %1614 }
 0x125   :  { %v242_v26 = vadd.f32 1.0, %v1615_v25 }
 0x126   :  { %v1617_v27 = vpop.eup %1616 }
 0x127   :  { %v243_v28 = vadd.f32 1.0, %v1617_v27  ;;  %1618 = vrcp.f32 %v242_v26 }
 0x129   :  { %1620 = vrcp.f32 %v243_v28 }
 0x131   :  { %v1619_v29 = vpop.eup %1618 }
 0x132   :  { %v248_v33 = vmul.f32 2.0, %v1619_v29  ;;  %v252_v42 = vmul.f32 0.0, %v1619_v29 }
 0x133   :  { %v1621_v30 = vpop.eup %1620 }
 0x134   :  { %v249_v31 = vmul.f32 2.0, %v1621_v30  ;;  %v1375_v34 = vadd.f32 -1.0, %v248_v33  ;;  %v253_v39 = vmul.f32 0.0, %v1621_v30 }
 0x136   :  { %v1376_v32 = vadd.f32 -1.0, %v249_v31 }
 0x138   :  { %258 = vrot.lane.b32.xlu0 %v1376_v32, %s1812_s3 }
 0x13c   :  { %256 = vrot.lane.b32.xlu0 %v1375_v34, %s1812_s3 }
 0x1aa   :  { %v259_v35 = vpop.permute.xlu0 %258 }
 0x1ab   :  { %v263_v36 = vmul.f32 %v1621_v30, %v259_v35 }
 0x1ad   :  { %268 = vrot.lane.b32.xlu1 %v263_v36, %s1813_s26 }
 0x1ae   :  { %v257_v37 = vpop.permute.xlu0 %256 }
 0x1af   :  { %v262_v38 = vmul.f32 %v1619_v29, %v257_v37 }
 0x1b1   :  { %266 = vrot.lane.b32.xlu1 %v262_v38, %s1813_s26 }
 0x21f   :  { %v269_v40 = vpop.permute.xlu1 %268 }
 0x220   :  { %v273_v41 = vadd.f32 %v269_v40, %v253_v39 }
 0x222   :  { %1622 = vtanh.f32 %v273_v41  ;;  %v399_v15 = vrot.slane %v273_v41, 7 }
 0x223   :  { %v267_v43 = vpop.permute.xlu1 %266 }
 0x224   :  { %v272_v44 = vadd.f32 %v267_v43, %v252_v42 }
 0x226   :  { %1624 = vtanh.f32 %v272_v44  ;;  %v398_v18 = vrot.slane %v272_v44, 7 }
 0x22c   :  { %v1623_v45 = vpop.eup %1622 }
 0x22d   :  { %280 = vrot.lane.b32.xlu0 %v1623_v45, %s1812_s3 }
 0x230   :  { %v1625_v46 = vpop.eup %1624 }
 0x231   :  { %278 = vrot.lane.b32.xlu1 %v1625_v46, %s1812_s3 }
 0x29f   :  { %v281_v47 = vpop.permute.xlu0 %280 }
 0x2a0   :  { %v1934_v48 = vmul.f32 %v1621_v30, %v281_v47 }
 0x2a2   :  { %v297_v50 = vrot.slane %v1934_v48, 7 }
 0x2a3   :  { %v279_v49 = vpop.permute.xlu1 %278 }
 0x2a4   :  { %v1937_v51 = vmul.f32 %v1619_v29, %v279_v49 }
 0x2a6   :  { %v299_v52 = vsel %vm298_vm2, %v297_v50, %v1937_v51 }
 0x2a7   :  { %300 = vrot.lane.b32.xlu0 %v299_v52, %s1813_s26 }
 0x319   :  { %v301_v53 = vpop.permute.xlu0 %300 }
 0x31a   :  { %1483 = vmatmul.mubr.msk.f32.vlgmr.msra.gmra.mrb[2].mxu0 %vm156_vm3, %v301_v53 }
 0x31b   :  { %1575 = vmatpush3.bf16.msra.mxu0 %v1895_v8  ;;  %1504 = vmatprep.mubr.msk.f32.mxu0 %vm1810_vm0, %v1811_v1 }
 0x31c   :  { %1576 = vmatprep.subr.bf16.mxu0 %v1809_v0 }
 0x31f   :  { %1578 = vmatpush3.bf16.msra.mxu0 %v1899_v12 }
 0x320   :  { %1585 = vmatprep.subr.bf16.mxu0 %v1809_v0 }
 0x3ed   :  { %v370_v54 = vpop.f32.mrb[2].mxu0 }
 0x3ee   :  { %v375_v55 = vrot.slane %v370_v54, 7  ;;  %v379_v56 = vadd.f32 %v370_v54, %v1924_v17  ;;  %v1484_v57 = vpop.f32.mrb[3].mxu0 }
 0x3f0   :  { %v378_v58 = vadd.f32 %v375_v55, %v1922_v16  ;;  %v1379_v59 = vmul.f32 -1.442695, %v379_v56 }
 0x3f2   :  { %v1378_v60 = vmul.f32 -1.442695, %v378_v58  ;;  %1626 = vpow2.f32 %v1379_v59 }
 0x3f4   :  { %1628 = vpow2.f32 %v1378_v60 }
 0x3fc   :  { %v1627_v61 = vpop.eup %1626 }
 0x3fd   :  { %v387_v62 = vadd.f32 1.0, %v1627_v61 }
 0x3fe   :  { %v1629_v63 = vpop.eup %1628 }
 0x3ff   :  { %v386_v2 = vadd.f32 1.0, %v1629_v63  ;;  %1630 = vrcp.f32 %v387_v62 }
 0x401   :  { %1632 = vrcp.f32 %v386_v2 }
 0x409   :  { %v1631_v3 = vpop.eup %1630 }
 0x40a   :  { %v393_v4 = vmul.f32 2.0, %v1631_v3  ;;  %v403_v19 = vmul.f32 %v1631_v3, %v399_v15 }
 0x40b   :  { %v1633_v5 = vpop.eup %1632 }
 0x40c   :  { %v1381_v6 = vadd.f32 -1.0, %v393_v4  ;;  %v392_v7 = vmul.f32 2.0, %v1633_v5  ;;  %v402_v22 = vmul.f32 %v1633_v5, %v398_v18 }
 0x40e   :  { %408 = vrot.lane.b32.xlu0 %v1381_v6, %s1812_s3  ;;  %v1380_v9 = vadd.f32 -1.0, %v392_v7 }
 0x410   :  { %406 = vrot.lane.b32.xlu1 %v1380_v9, %s1812_s3 }
 0x480   :  { %v409_v10 = vpop.permute.xlu0 %408 }
 0x481   :  { %v413_v11 = vmul.f32 %v1631_v3, %v409_v10 }
 0x482   :  { %v407_v13 = vpop.permute.xlu1 %406 }
 0x483   :  { %v412_v14 = vmul.f32 %v1633_v5, %v407_v13  ;;  %418 = vrot.lane.b32.xlu0 %v413_v11, %s1813_s26 }
 0x485   :  { %416 = vrot.lane.b32.xlu1 %v412_v14, %s1813_s26 }
 0x4f5   :  { %v419_v20 = vpop.permute.xlu0 %418 }
 0x4f6   :  { %v423_v21 = vadd.f32 %v419_v20, %v403_v19 }
 0x4f7   :  { %v417_v23 = vpop.permute.xlu1 %416 }
 0x4f8   :  { %1634 = vtanh.f32 %v423_v21  ;;  %v422_v24 = vadd.f32 %v417_v23, %v402_v22  ;;  %v549_v59 = vrot.slane %v423_v21, 7 }
 0x4fa   :  { %1636 = vtanh.f32 %v422_v24  ;;  %v548_v58 = vrot.slane %v422_v24, 7 }
 0x502   :  { %v1635_v25 = vpop.eup %1634 }
 0x503   :  { %430 = vrot.lane.b32.xlu0 %v1635_v25, %s1812_s3 }
 0x504   :  { %v1637_v26 = vpop.eup %1636 }
 0x505   :  { %428 = vrot.lane.b32.xlu1 %v1637_v26, %s1812_s3 }
 0x575   :  { %v431_v27 = vpop.permute.xlu0 %430 }
 0x576   :  { %v1959_v30 = vmul.f32 %v1631_v3, %v431_v27 }
 0x577   :  { %v429_v28 = vpop.permute.xlu1 %428 }
 0x578   :  { %v1957_v29 = vmul.f32 %v1633_v5, %v429_v28 }
 0x57a   :  { %v447_v31 = vrot.slane %v1957_v29, 1 }
 0x57c   :  { %v448_v32 = vsel %vm298_vm2, %v1959_v30, %v447_v31 }
 0x57d   :  { %449 = vrot.lane.b32.xlu1 %v448_v32, %s1813_s26 }
 0x5ef   :  { %v450_v33 = vpop.permute.xlu1 %449 }
 0x5f0   :  { %1494 = vmatmul.mubr.msk.f32.vlgmr.msra.gmra.mrb[2].mxu1 %vm156_vm3, %v450_v33 }
 0x5f1   :  { %1581 = vmatpush3.bf16.msra.mxu1 %v1895_v8  ;;  %1515 = vmatprep.mubr.msk.f32.mxu1 %vm1810_vm0, %v1811_v1 }
 0x5f2   :  { %1582 = vmatprep.subr.bf16.mxu1 %v1809_v0 }
 0x5f5   :  { %1584 = vmatpush3.bf16.msra.mxu1 %v1899_v12 }
 0x5f6   :  { %1591 = vmatprep.subr.bf16.mxu1 %v1809_v0 }
 0x6c3   :  { %v519_v34 = vpop.f32.mrb[2].mxu1 }
 0x6c4   :  { %v524_v35 = vrot.slane %v519_v34, 6  ;;  %v525_v36 = vrot.slane %v519_v34, 7  ;;  %v1495_v37 = vpop.f32.mrb[3].mxu1 }
 0x6c6   :  { %v528_v38 = vadd.f32 %v524_v35, %v1922_v16  ;;  %v529_v39 = vadd.f32 %v525_v36, %v1924_v17 }
 0x6c8   :  { %v1383_v40 = vmul.f32 -1.442695, %v528_v38  ;;  %v1384_v41 = vmul.f32 -1.442695, %v529_v39 }
 0x6ca   :  { %1638 = vpow2.f32 %v1383_v40 }
 0x6cb   :  { %1640 = vpow2.f32 %v1384_v41 }
 0x6d4   :  { %v1639_v42 = vpop.eup %1638 }
 0x6d5   :  { %v1641_v43 = vpop.eup %1640  ;;  %v536_v44 = vadd.f32 1.0, %v1639_v42 }
 0x6d6   :  { %v537_v45 = vadd.f32 1.0, %v1641_v43 }
 0x6d7   :  { %1642 = vrcp.f32 %v536_v44 }
 0x6d8   :  { %1644 = vrcp.f32 %v537_v45 }
 0x6e1   :  { %v1643_v46 = vpop.eup %1642 }
 0x6e2   :  { %v1645_v47 = vpop.eup %1644  ;;  %v542_v49 = vmul.f32 2.0, %v1643_v46  ;;  %v552_v60 = vmul.f32 %v1643_v46, %v548_v58 }
 0x6e3   :  { %v543_v50 = vmul.f32 2.0, %v1645_v47  ;;  %v553_v61 = vmul.f32 %v1645_v47, %v549_v59 }
 0x6e4   :  { %v1385_v52 = vadd.f32 -1.0, %v542_v49 }
 0x6e5   :  { %v1386_v53 = vadd.f32 -1.0, %v543_v50 }
 0x6e6   :  { %556 = vrot.lane.b32.xlu0 %v1385_v52, %s1812_s3 }
 0x6e7   :  { %558 = vrot.lane.b32.xlu1 %v1386_v53, %s1812_s3 }
 0x758   :  { %v557_v54 = vpop.permute.xlu0 %556 }
 0x759   :  { %v559_v55 = vpop.permute.xlu1 %558  ;;  %v562_v56 = vmul.f32 %v1643_v46, %v557_v54 }
 0x75a   :  { %v563_v57 = vmul.f32 %v1645_v47, %v559_v55 }
 0x75b   :  { %566 = vrot.lane.b32.xlu0 %v562_v56, %s1813_s26 }
 0x75c   :  { %568 = vrot.lane.b32.xlu1 %v563_v57, %s1813_s26 }
 0x7cd   :  { %v567_v62 = vpop.permute.xlu0 %566 }
 0x7ce   :  { %v569_v63 = vpop.permute.xlu1 %568  ;;  %v572_v2 = vadd.f32 %v567_v62, %v552_v60 }
 0x7cf   :  { %v573_v3 = vadd.f32 %v569_v63, %v553_v61 }
 0x7d0   :  { %1646 = vtanh.f32 %v572_v2  ;;  %v699_v42 = vrot.slane %v572_v2, 7 }
 0x7d1   :  { %1648 = vtanh.f32 %v573_v3  ;;  %v700_v43 = vrot.slane %v573_v3, 7 }
 0x7da   :  { %v1647_v4 = vpop.eup %1646 }
 0x7db   :  { %v1649_v5 = vpop.eup %1648  ;;  %578 = vrot.lane.b32.xlu0 %v1647_v4, %s1812_s3 }
 0x7dc   :  { %580 = vrot.lane.b32.xlu1 %v1649_v5, %s1812_s3 }
 0x84d   :  { %v579_v6 = vpop.permute.xlu0 %578 }
 0x84e   :  { %v581_v7 = vpop.permute.xlu1 %580  ;;  %v1980_v9 = vmul.f32 %v1643_v46, %v579_v6 }
 0x84f   :  { %v1982_v10 = vmul.f32 %v1645_v47, %v581_v7 }
 0x850   :  { %v597_v11 = vrot.slane %v1980_v9, 2 }
 0x851   :  { %v598_v13 = vrot.slane %v1982_v10, 1 }
 0x853   :  { %v599_v14 = vsel %vm298_vm2, %v598_v13, %v597_v11 }
 0x854   :  { %600 = vrot.lane.b32.xlu0 %v599_v14, %s1813_s26 }
 0x8c6   :  { %v601_v15 = vpop.permute.xlu0 %600 }
 0x8c7   :  { %1505 = vmatmul.mubr.msk.f32.vlgmr.msra.gmra.mrb[4].mxu0 %vm156_vm3, %v601_v15 }
 0x8c8   :  { %1587 = vmatpush3.bf16.msra.mxu0 %v1895_v8  ;;  %1526 = vmatprep.mubr.msk.f32.mxu0 %vm1810_vm0, %v1811_v1 }
 0x8c9   :  { %1588 = vmatprep.subr.bf16.mxu0 %v1809_v0 }
 0x8cc   :  { %1590 = vmatpush3.bf16.msra.mxu0 %v1899_v12 }
 0x8cd   :  { %1597 = vmatprep.subr.bf16.mxu0 %v1809_v0 }
 0x99a   :  { %v670_v18 = vpop.f32.mrb[4].mxu0 }
 0x99b   :  { %v675_v19 = vrot.slane %v670_v18, 5  ;;  %v676_v20 = vrot.slane %v670_v18, 6  ;;  %v1506_v21 = vpop.f32.mrb[5].mxu0 }
 0x99d   :  { %v679_v22 = vadd.f32 %v675_v19, %v1922_v16  ;;  %v680_v23 = vadd.f32 %v676_v20, %v1924_v17 }
 0x99f   :  { %v1388_v24 = vmul.f32 -1.442695, %v679_v22  ;;  %v1389_v25 = vmul.f32 -1.442695, %v680_v23 }
 0x9a1   :  { %1650 = vpow2.f32 %v1388_v24 }
 0x9a2   :  { %1652 = vpow2.f32 %v1389_v25 }
 0x9ab   :  { %v1651_v26 = vpop.eup %1650 }
 0x9ac   :  { %v1653_v27 = vpop.eup %1652  ;;  %v687_v28 = vadd.f32 1.0, %v1651_v26 }
 0x9ad   :  { %v688_v31 = vadd.f32 1.0, %v1653_v27 }
 0x9ae   :  { %1654 = vrcp.f32 %v687_v28 }
 0x9af   :  { %1656 = vrcp.f32 %v688_v31 }
 0x9b8   :  { %v1655_v32 = vpop.eup %1654 }
 0x9b9   :  { %v1657_v33 = vpop.eup %1656  ;;  %v693_v34 = vmul.f32 2.0, %v1655_v32  ;;  %v703_v44 = vmul.f32 %v1655_v32, %v699_v42 }
 0x9ba   :  { %v694_v35 = vmul.f32 2.0, %v1657_v33  ;;  %v704_v45 = vmul.f32 %v1657_v33, %v700_v43 }
 0x9bb   :  { %v1390_v36 = vadd.f32 -1.0, %v693_v34 }
 0x9bc   :  { %v1391_v37 = vadd.f32 -1.0, %v694_v35 }
 0x9bd   :  { %707 = vrot.lane.b32.xlu1 %v1390_v36, %s1812_s3 }
 0x9be   :  { %709 = vrot.lane.b32.xlu0 %v1391_v37, %s1812_s3 }
 0xa2f   :  { %v708_v38 = vpop.permute.xlu1 %707 }
 0xa30   :  { %v710_v39 = vpop.permute.xlu0 %709  ;;  %v713_v40 = vmul.f32 %v1655_v32, %v708_v38 }
 0xa31   :  { %v714_v41 = vmul.f32 %v1657_v33, %v710_v39 }
 0xa32   :  { %717 = vrot.lane.b32.xlu1 %v713_v40, %s1813_s26 }
 0xa33   :  { %719 = vrot.lane.b32.xlu0 %v714_v41, %s1813_s26 }
 0xaa4   :  { %v718_v46 = vpop.permute.xlu1 %717 }
 0xaa5   :  { %v720_v47 = vpop.permute.xlu0 %719  ;;  %v723_v49 = vadd.f32 %v718_v46, %v703_v44 }
 0xaa6   :  { %v724_v50 = vadd.f32 %v720_v47, %v704_v45 }
 0xaa7   :  { %1658 = vtanh.f32 %v723_v49  ;;  %v850_v28 = vrot.slane %v723_v49, 7 }
 0xaa8   :  { %1660 = vtanh.f32 %v724_v50  ;;  %v851_v31 = vrot.slane %v724_v50, 7 }
 0xab1   :  { %v1659_v52 = vpop.eup %1658 }
 0xab2   :  { %v1661_v53 = vpop.eup %1660  ;;  %729 = vrot.lane.b32.xlu1 %v1659_v52, %s1812_s3 }
 0xab3   :  { %731 = vrot.lane.b32.xlu0 %v1661_v53, %s1812_s3 }
 0xb24   :  { %v730_v54 = vpop.permute.xlu1 %729 }
 0xb25   :  { %v732_v55 = vpop.permute.xlu0 %731  ;;  %v2003_v56 = vmul.f32 %v1655_v32, %v730_v54 }
 0xb26   :  { %v2005_v57 = vmul.f32 %v1657_v33, %v732_v55 }
 0xb27   :  { %v748_v58 = vrot.slane %v2003_v56, 3 }
 0xb28   :  { %v749_v59 = vrot.slane %v2005_v57, 2 }
 0xb2a   :  { %v750_v60 = vsel %vm298_vm2, %v749_v59, %v748_v58 }
 0xb2b   :  { %751 = vrot.lane.b32.xlu1 %v750_v60, %s1813_s26 }
 0xb9d   :  { %v752_v61 = vpop.permute.xlu1 %751 }
 0xb9e   :  { %1516 = vmatmul.mubr.msk.f32.vlgmr.msra.gmra.mrb[4].mxu1 %vm156_vm3, %v752_v61 }
 0xb9f   :  { %1593 = vmatpush3.bf16.msra.mxu1 %v1895_v8  ;;  %1537 = vmatprep.mubr.msk.f32.mxu1 %vm1810_vm0, %v1811_v1 }
 0xba0   :  { %1594 = vmatprep.subr.bf16.mxu1 %v1809_v0 }
 0xba3   :  { %1596 = vmatpush3.bf16.msra.mxu1 %v1899_v12 }
 0xc71   :  { %v821_v62 = vpop.f32.mrb[4].mxu1 }
 0xc72   :  { %v826_v63 = vrot.slane %v821_v62, 4  ;;  %v827_v2 = vrot.slane %v821_v62, 5  ;;  %v1517_v3 = vpop.f32.mrb[5].mxu1 }
 0xc74   :  { %v830_v4 = vadd.f32 %v826_v63, %v1922_v16  ;;  %v831_v5 = vadd.f32 %v827_v2, %v1924_v17 }
 0xc76   :  { %v1393_v6 = vmul.f32 -1.442695, %v830_v4  ;;  %v1394_v7 = vmul.f32 -1.442695, %v831_v5 }
 0xc78   :  { %1662 = vpow2.f32 %v1393_v6 }
 0xc79   :  { %1664 = vpow2.f32 %v1394_v7 }
 0xc82   :  { %v1663_v11 = vpop.eup %1662 }
 0xc83   :  { %v1665_v13 = vpop.eup %1664  ;;  %v838_v14 = vadd.f32 1.0, %v1663_v11 }
 0xc84   :  { %v839_v15 = vadd.f32 1.0, %v1665_v13 }
 0xc85   :  { %1666 = vrcp.f32 %v838_v14 }
 0xc86   :  { %1668 = vrcp.f32 %v839_v15 }
 0xc8f   :  { %v1667_v18 = vpop.eup %1666 }
 0xc90   :  { %v1669_v19 = vpop.eup %1668  ;;  %v844_v20 = vmul.f32 2.0, %v1667_v18  ;;  %v854_v32 = vmul.f32 %v1667_v18, %v850_v28 }
 0xc91   :  { %v845_v21 = vmul.f32 2.0, %v1669_v19  ;;  %v855_v33 = vmul.f32 %v1669_v19, %v851_v31 }
 0xc92   :  { %v1395_v22 = vadd.f32 -1.0, %v844_v20 }
 0xc93   :  { %v1396_v23 = vadd.f32 -1.0, %v845_v21 }
 0xc94   :  { %858 = vrot.lane.b32.xlu0 %v1395_v22, %s1812_s3 }
 0xc95   :  { %860 = vrot.lane.b32.xlu1 %v1396_v23, %s1812_s3 }
 0xd06   :  { %v859_v24 = vpop.permute.xlu0 %858 }
 0xd07   :  { %v861_v25 = vpop.permute.xlu1 %860  ;;  %v864_v26 = vmul.f32 %v1667_v18, %v859_v24 }
 0xd08   :  { %v865_v27 = vmul.f32 %v1669_v19, %v861_v25 }
 0xd09   :  { %868 = vrot.lane.b32.xlu0 %v864_v26, %s1813_s26 }
 0xd0a   :  { %870 = vrot.lane.b32.xlu1 %v865_v27, %s1813_s26 }
 0xd7b   :  { %v869_v34 = vpop.permute.xlu0 %868 }
 0xd7c   :  { %v871_v35 = vpop.permute.xlu1 %870  ;;  %v874_v36 = vadd.f32 %v869_v34, %v854_v32 }
 0xd7d   :  { %v875_v37 = vadd.f32 %v871_v35, %v855_v33 }
 0xd7e   :  { %1670 = vtanh.f32 %v874_v36  ;;  %v1001_v11 = vrot.slane %v874_v36, 7 }
 0xd7f   :  { %1672 = vtanh.f32 %v875_v37  ;;  %v1002_v13 = vrot.slane %v875_v37, 7 }
 0xd88   :  { %v1671_v38 = vpop.eup %1670 }
 0xd89   :  { %v1673_v39 = vpop.eup %1672  ;;  %880 = vrot.lane.b32.xlu0 %v1671_v38, %s1812_s3 }
 0xd8a   :  { %882 = vrot.lane.b32.xlu1 %v1673_v39, %s1812_s3 }
 0xdfb   :  { %v881_v40 = vpop.permute.xlu0 %880 }
 0xdfc   :  { %v883_v41 = vpop.permute.xlu1 %882  ;;  %v2025_v42 = vmul.f32 %v1667_v18, %v881_v40 }
 0xdfd   :  { %v2027_v43 = vmul.f32 %v1669_v19, %v883_v41 }
 0xdfe   :  { %v899_v44 = vrot.slane %v2025_v42, 4 }
 0xdff   :  { %v900_v45 = vrot.slane %v2027_v43, 3 }
 0xe01   :  { %v901_v46 = vsel %vm298_vm2, %v900_v45, %v899_v44 }
 0xe02   :  { %902 = vrot.lane.b32.xlu0 %v901_v46, %s1813_s26 }
 0xe74   :  { %v903_v47 = vpop.permute.xlu0 %902 }
 0xe75   :  { %1527 = vmatmul.mubr.msk.f32.vlgmr.msra.gmra.mrb[6].mxu0 %vm156_vm3, %v903_v47 }
 0xe76   :  { %1599 = vmatpush3.bf16.msra.mxu0 %v1895_v8  ;;  %1548 = vmatprep.mubr.msk.f32.mxu0 %vm1810_vm0, %v1811_v1 }
 0xe77   :  { %1600 = vmatprep.subr.bf16.mxu0 %v1809_v0 }
 0xe7a   :  { %1602 = vmatpush3.bf16.msra.mxu0 %v1899_v12 }
 0xf48   :  { %v972_v49 = vpop.f32.mrb[6].mxu0 }
 0xf49   :  { %v977_v50 = vrot.slane %v972_v49, 3  ;;  %v978_v52 = vrot.slane %v972_v49, 4  ;;  %v1528_v53 = vpop.f32.mrb[7].mxu0 }
 0xf4b   :  { %v981_v54 = vadd.f32 %v977_v50, %v1922_v16  ;;  %v982_v55 = vadd.f32 %v978_v52, %v1924_v17 }
 0xf4d   :  { %v1398_v58 = vmul.f32 -1.442695, %v981_v54  ;;  %v1399_v59 = vmul.f32 -1.442695, %v982_v55 }
 0xf4f   :  { %1674 = vpow2.f32 %v1398_v58 }
 0xf50   :  { %1676 = vpow2.f32 %v1399_v59 }
 0xf59   :  { %v1675_v8 = vpop.eup %1674 }
 0xf5a   :  { %v1677_v60 = vpop.eup %1676  ;;  %v989_v61 = vadd.f32 1.0, %v1675_v8 }
 0xf5b   :  { %v990_v1 = vadd.f32 1.0, %v1677_v60 }
 0xf5c   :  { %1678 = vrcp.f32 %v989_v61 }
 0xf5d   :  { %1680 = vrcp.f32 %v990_v1 }
 0xf66   :  { %v1679_v0 = vpop.eup %1678 }
 0xf67   :  { %v1681_v12 = vpop.eup %1680  ;;  %v995_v62 = vmul.f32 2.0, %v1679_v0  ;;  %v1005_v14 = vmul.f32 %v1679_v0, %v1001_v11 }
 0xf68   :  { %v996_v63 = vmul.f32 2.0, %v1681_v12  ;;  %v1006_v15 = vmul.f32 %v1681_v12, %v1002_v13 }
 0xf69   :  { %v1400_v2 = vadd.f32 -1.0, %v995_v62 }
 0xf6a   :  { %v1401_v3 = vadd.f32 -1.0, %v996_v63 }
 0xf6b   :  { %1009 = vrot.lane.b32.xlu1 %v1400_v2, %s1812_s3 }
 0xf6c   :  { %1011 = vrot.lane.b32.xlu0 %v1401_v3, %s1812_s3 }
 0xfdd   :  { %v1010_v4 = vpop.permute.xlu1 %1009 }
 0xfde   :  { %v1012_v5 = vpop.permute.xlu0 %1011  ;;  %v1015_v6 = vmul.f32 %v1679_v0, %v1010_v4 }
 0xfdf   :  { %v1016_v7 = vmul.f32 %v1681_v12, %v1012_v5 }
 0xfe0   :  { %1019 = vrot.lane.b32.xlu1 %v1015_v6, %s1813_s26 }
 0xfe1   :  { %1021 = vrot.lane.b32.xlu0 %v1016_v7, %s1813_s26 }
0x1052   :  { %v1020_v18 = vpop.permute.xlu1 %1019 }
0x1053   :  { %v1022_v19 = vpop.permute.xlu0 %1021  ;;  %v1025_v20 = vadd.f32 %v1020_v18, %v1005_v14 }
0x1054   :  { %v1026_v21 = vadd.f32 %v1022_v19, %v1006_v15 }
0x1055   :  { %1682 = vtanh.f32 %v1025_v20  ;;  %v1152_v61 = vrot.slane %v1025_v20, 7 }
0x1056   :  { %1684 = vtanh.f32 %v1026_v21  ;;  %v1153_v1 = vrot.slane %v1026_v21, 7 }
0x105f   :  { %v1683_v22 = vpop.eup %1682 }
0x1060   :  { %v1685_v23 = vpop.eup %1684  ;;  %1031 = vrot.lane.b32.xlu1 %v1683_v22, %s1812_s3 }
0x1061   :  { %1033 = vrot.lane.b32.xlu0 %v1685_v23, %s1812_s3 }
0x10d2   :  { %v1032_v24 = vpop.permute.xlu1 %1031 }
0x10d3   :  { %v1034_v25 = vpop.permute.xlu0 %1033  ;;  %v2047_v26 = vmul.f32 %v1679_v0, %v1032_v24 }
0x10d4   :  { %v2049_v27 = vmul.f32 %v1681_v12, %v1034_v25 }
0x10d5   :  { %v1050_v28 = vrot.slane %v2047_v26, 5 }
0x10d6   :  { %v1051_v31 = vrot.slane %v2049_v27, 4 }
0x10d8   :  { %v1052_v32 = vsel %vm298_vm2, %v1051_v31, %v1050_v28 }
0x10d9   :  { %1053 = vrot.lane.b32.xlu1 %v1052_v32, %s1813_s26 }
0x114b   :  { %v1054_v33 = vpop.permute.xlu1 %1053 }
0x114c   :  { %1538 = vmatmul.mubr.msk.f32.vlgmr.msra.gmra.mrb[6].mxu1 %vm156_vm3, %v1054_v33 }
0x121f   :  { %v1123_v34 = vpop.f32.mrb[6].mxu1 }
0x1220   :  { %v1128_v35 = vrot.slane %v1123_v34, 2  ;;  %v1129_v36 = vrot.slane %v1123_v34, 3  ;;  %v1539_v37 = vpop.f32.mrb[7].mxu1 }
0x1222   :  { %v1132_v38 = vadd.f32 %v1128_v35, %v1922_v16  ;;  %v1133_v39 = vadd.f32 %v1129_v36, %v1924_v17 }
0x1224   :  { %v1403_v40 = vmul.f32 -1.442695, %v1132_v38  ;;  %v1404_v41 = vmul.f32 -1.442695, %v1133_v39 }
0x1226   :  { %1686 = vpow2.f32 %v1403_v40 }
0x1227   :  { %1688 = vpow2.f32 %v1404_v41 }
0x1230   :  { %v1687_v44 = vpop.eup %1686 }
0x1231   :  { %v1689_v45 = vpop.eup %1688  ;;  %v1140_v46 = vadd.f32 1.0, %v1687_v44 }
0x1232   :  { %v1141_v47 = vadd.f32 1.0, %v1689_v45 }
0x1233   :  { %1690 = vrcp.f32 %v1140_v46 }
0x1234   :  { %1692 = vrcp.f32 %v1141_v47 }
0x123d   :  { %v1691_v49 = vpop.eup %1690 }
0x123e   :  { %v1693_v50 = vpop.eup %1692  ;;  %v1146_v52 = vmul.f32 2.0, %v1691_v49  ;;  %v1156_v0 = vmul.f32 %v1691_v49, %v1152_v61 }
0x123f   :  { %v1147_v53 = vmul.f32 2.0, %v1693_v50  ;;  %v1157_v12 = vmul.f32 %v1693_v50, %v1153_v1 }
0x1240   :  { %v1405_v54 = vadd.f32 -1.0, %v1146_v52 }
0x1241   :  { %v1406_v55 = vadd.f32 -1.0, %v1147_v53 }
0x1242   :  { %1160 = vrot.lane.b32.xlu0 %v1405_v54, %s1812_s3 }
0x1243   :  { %1162 = vrot.lane.b32.xlu1 %v1406_v55, %s1812_s3 }
0x12b4   :  { %v1161_v58 = vpop.permute.xlu0 %1160 }
0x12b5   :  { %v1163_v59 = vpop.permute.xlu1 %1162  ;;  %v1166_v8 = vmul.f32 %v1691_v49, %v1161_v58 }
0x12b6   :  { %v1167_v60 = vmul.f32 %v1693_v50, %v1163_v59 }
0x12b7   :  { %1170 = vrot.lane.b32.xlu0 %v1166_v8, %s1813_s26 }
0x12b8   :  { %1172 = vrot.lane.b32.xlu1 %v1167_v60, %s1813_s26 }
0x1329   :  { %v1171_v62 = vpop.permute.xlu0 %1170 }
0x132a   :  { %v1173_v63 = vpop.permute.xlu1 %1172  ;;  %v1176_v2 = vadd.f32 %v1171_v62, %v1156_v0 }
0x132b   :  { %v1177_v3 = vadd.f32 %v1173_v63, %v1157_v12 }
0x132c   :  { %1694 = vtanh.f32 %v1176_v2  ;;  %v1303_v46 = vrot.slane %v1176_v2, 7 }
0x132d   :  { %1696 = vtanh.f32 %v1177_v3  ;;  %v1304_v47 = vrot.slane %v1177_v3, 7 }
0x1336   :  { %v1695_v4 = vpop.eup %1694 }
0x1337   :  { %v1697_v5 = vpop.eup %1696  ;;  %1182 = vrot.lane.b32.xlu0 %v1695_v4, %s1812_s3 }
0x1338   :  { %1184 = vrot.lane.b32.xlu1 %v1697_v5, %s1812_s3 }
0x13a9   :  { %v1183_v6 = vpop.permute.xlu0 %1182 }
0x13aa   :  { %v1185_v7 = vpop.permute.xlu1 %1184  ;;  %v2064_v11 = vmul.f32 %v1691_v49, %v1183_v6 }
0x13ab   :  { %v2066_v13 = vmul.f32 %v1693_v50, %v1185_v7 }
0x13ac   :  { %v1201_v14 = vrot.slane %v2064_v11, 6 }
0x13ad   :  { %v1202_v15 = vrot.slane %v2066_v13, 5 }
0x13af   :  { %v1203_v18 = vsel %vm298_vm2, %v1202_v15, %v1201_v14 }
0x13b0   :  { %1204 = vrot.lane.b32.xlu0 %v1203_v18, %s1813_s26 }
0x1422   :  { %v1205_v19 = vpop.permute.xlu0 %1204 }
0x1423   :  { %1549 = vmatmul.mubr.msk.f32.vlgmr.msra.gmra.mrb[8].mxu0 %vm156_vm3, %v1205_v19 }
0x14f6   :  { %v1274_v20 = vpop.f32.mrb[8].mxu0 }
0x14f7   :  { %v1279_v21 = vrot.slane %v1274_v20, 1  ;;  %v1280_v22 = vrot.slane %v1274_v20, 2  ;;  %v1550_v23 = vpop.f32.mrb[9].mxu0 }
0x14f9   :  { %v1283_v24 = vadd.f32 %v1279_v21, %v1922_v16  ;;  %v1284_v25 = vadd.f32 %v1280_v22, %v1924_v17 }
0x14fb   :  { %v1408_v28 = vmul.f32 -1.442695, %v1283_v24  ;;  %v1409_v31 = vmul.f32 -1.442695, %v1284_v25 }
0x14fd   :  { %1698 = vpow2.f32 %v1408_v28 }
0x14fe   :  { %1700 = vpow2.f32 %v1409_v31 }
0x1507   :  { %v1699_v32 = vpop.eup %1698 }
0x1508   :  { %v1701_v33 = vpop.eup %1700  ;;  %v1291_v34 = vadd.f32 1.0, %v1699_v32 }
0x1509   :  { %v1292_v35 = vadd.f32 1.0, %v1701_v33 }
0x150a   :  { %1702 = vrcp.f32 %v1291_v34 }
0x150b   :  { %1704 = vrcp.f32 %v1292_v35 }
0x1514   :  { %v1703_v36 = vpop.eup %1702 }
0x1515   :  { %v1705_v37 = vpop.eup %1704  ;;  %v1297_v38 = vmul.f32 2.0, %v1703_v36  ;;  %v1307_v49 = vmul.f32 %v1703_v36, %v1303_v46 }
0x1516   :  { %v1298_v39 = vmul.f32 2.0, %v1705_v37  ;;  %v1308_v50 = vmul.f32 %v1705_v37, %v1304_v47 }
0x1517   :  { %v1410_v40 = vadd.f32 -1.0, %v1297_v38 }
0x1518   :  { %v1411_v41 = vadd.f32 -1.0, %v1298_v39 }
0x1519   :  { %1311 = vrot.lane.b32.xlu1 %v1410_v40, %s1812_s3 }
0x151a   :  { %1313 = vrot.lane.b32.xlu0 %v1411_v41, %s1812_s3 }
0x158b   :  { %v1312_v16 = vpop.permute.xlu1 %1311 }
0x158c   :  { %v1314_v17 = vpop.permute.xlu0 %1313  ;;  %v1317_v44 = vmul.f32 %v1703_v36, %v1312_v16 }
0x158d   :  { %v1318_v45 = vmul.f32 %v1705_v37, %v1314_v17 }
0x158e   :  { %1321 = vrot.lane.b32.xlu1 %v1317_v44, %s1813_s26 }
0x158f   :  { %1323 = vrot.lane.b32.xlu0 %v1318_v45, %s1813_s26 }
0x1600   :  { %v1322_v52 = vpop.permute.xlu1 %1321 }
0x1601   :  { %v1324_v53 = vpop.permute.xlu0 %1323  ;;  %v1327_v54 = vadd.f32 %v1322_v52, %v1307_v49 }
0x1602   :  { %v1328_v55 = vadd.f32 %v1324_v53, %v1308_v50 }
0x1603   :  { %1706 = vtanh.f32 %v1327_v54 }
0x1604   :  { %1708 = vtanh.f32 %v1328_v55 }
0x160d   :  { %v1707_v58 = vpop.eup %1706 }
0x160e   :  { %v1709_v59 = vpop.eup %1708  ;;  %1333 = vrot.lane.b32.xlu1 %v1707_v58, %s1812_s3 }
0x160f   :  { %1335 = vrot.lane.b32.xlu0 %v1709_v59, %s1812_s3 }
0x1612   :  { %288 = vrot.lane.b32.xlu1 %v1937_v51, %s1813_s26 }
0x1613   :  { %290 = vrot.lane.b32.xlu0 %v1934_v48, %s1813_s26 }
0x1616   :  { %438 = vrot.lane.b32.xlu1 %v1957_v29, %s1813_s26 }
0x1617   :  { %440 = vrot.lane.b32.xlu0 %v1959_v30, %s1813_s26 }
0x161a   :  { %588 = vrot.lane.b32.xlu1 %v1980_v9, %s1813_s26 }
0x161b   :  { %590 = vrot.lane.b32.xlu0 %v1982_v10, %s1813_s26 }
0x161e   :  { %739 = vrot.lane.b32.xlu1 %v2003_v56, %s1813_s26 }
0x161f   :  { %741 = vrot.lane.b32.xlu0 %v2005_v57, %s1813_s26 }
0x1622   :  { %890 = vrot.lane.b32.xlu1 %v2025_v42, %s1813_s26 }
0x1623   :  { %892 = vrot.lane.b32.xlu0 %v2027_v43, %s1813_s26 }
0x1626   :  { %1041 = vrot.lane.b32.xlu1 %v2047_v26, %s1813_s26 }
0x1627   :  { %1043 = vrot.lane.b32.xlu0 %v2049_v27, %s1813_s26 }
0x162a   :  { %1192 = vrot.lane.b32.xlu1 %v2064_v11, %s1813_s26 }
0x162b   :  { %1194 = vrot.lane.b32.xlu0 %v2066_v13, %s1813_s26 }
0x1680   :  { %v1334_v48 = vpop.permute.xlu1 %1333 }
0x1681   :  { %v1336_v51 = vpop.permute.xlu0 %1335  ;;  %v1339_v29 = vmul.f32 %v1703_v36, %v1334_v48 }
0x1682   :  { %v1340_v30 = vmul.f32 %v1705_v37, %v1336_v51 }
0x1683   :  { %1343 = vrot.lane.b32.xlu1 %v1339_v29, %s1813_s26 }
0x1684   :  { %1345 = vrot.lane.b32.xlu0 %v1340_v30, %s1813_s26  ;;  %v289_v9 = vpop.permute.xlu1 %288 }
0x1685   :  { %v291_v10 = vpop.permute.xlu0 %290  ;;  %295 = vst.msk [vmem:[#allocation8] sm:$0x1] %vm294_vm4, %v289_v9 }
0x1686   :  { %296 = vst.msk [vmem:[#allocation8 + $0x8] sm:$0x1] %vm294_vm4, %v291_v10 }
0x1688   :  { %v439_v56 = vpop.permute.xlu1 %438 }
0x1689   :  { %v441_v57 = vpop.permute.xlu0 %440  ;;  %445 = vst.msk [vmem:[#allocation8] sm:$0x2] %vm444_vm5, %v439_v56 }
0x168a   :  { %446 = vst.msk [vmem:[#allocation8 + $0x8] sm:$0x2] %vm444_vm5, %v441_v57 }
0x168c   :  { %v589_v42 = vpop.permute.xlu1 %588 }
0x168d   :  { %v591_v43 = vpop.permute.xlu0 %590  ;;  %595 = vst.msk [vmem:[#allocation8] sm:$0x4] %vm594_vm6, %v589_v42 }
0x168e   :  { %596 = vst.msk [vmem:[#allocation8 + $0x8] sm:$0x4] %vm594_vm6, %v591_v43 }
0x1690   :  { %v740_v26 = vpop.permute.xlu1 %739 }
0x1691   :  { %v742_v27 = vpop.permute.xlu0 %741  ;;  %746 = vst.msk [vmem:[#allocation8] sm:$0x8] %vm745_vm7, %v740_v26 }
0x1692   :  { %747 = vst.msk [vmem:[#allocation8 + $0x8] sm:$0x8] %vm745_vm7, %v742_v27 }
0x1694   :  { %v891_v8 = vpop.permute.xlu1 %890 }
0x1695   :  { %v893_v60 = vpop.permute.xlu0 %892  ;;  %897 = vst.msk [vmem:[#allocation8] sm:$0x10] %vm896_vm8, %v891_v8 }
0x1696   :  { %898 = vst.msk [vmem:[#allocation8 + $0x8] sm:$0x10] %vm896_vm8, %v893_v60 }
0x1698   :  { %v1042_v61 = vpop.permute.xlu1 %1041 }
0x1699   :  { %v1044_v1 = vpop.permute.xlu0 %1043  ;;  %1048 = vst.msk [vmem:[#allocation8] sm:$0x20] %vm1047_vm9, %v1042_v61 }
0x169a   :  { %1049 = vst.msk [vmem:[#allocation8 + $0x8] sm:$0x20] %vm1047_vm9, %v1044_v1 }
0x169c   :  { %v1193_v0 = vpop.permute.xlu1 %1192 }
0x169d   :  { %v1195_v12 = vpop.permute.xlu0 %1194  ;;  %1199 = vst.msk [vmem:[#allocation8] sm:$0x40] %vm1198_vm10, %v1193_v0 }
0x169e   :  { %1200 = vst.msk [vmem:[#allocation8 + $0x8] sm:$0x40] %vm1198_vm10, %v1195_v12 }
0x16f5   :  { %v1344_v62 = vpop.permute.xlu1 %1343 }
0x16f6   :  { %v1346_v63 = vpop.permute.xlu0 %1345  ;;  %1350 = vst.msk [vmem:[#allocation8] sm:$0x80] %vm1349_vm11, %v1344_v62 }
0x16f7   :  { %1351 = vst.msk [vmem:[#allocation8 + $0x8] sm:$0x80] %vm1349_vm11, %v1346_v63 }
0x16f8   :  { %1787 = shalt.err (!%p1784_p0)
}
0x16f9   :  { %s1788_s8 = scalar_lea.hbm %s2130_s4, 256 }
0x16fa   :  { %p1789_p1 = scmp.ne.s32.totalorder %s2130_s4, %s1788_s8  ;;  %p1792_p2 = scmp.lt.u32.totalorder %s1788_s8, %s2130_s4 }
0x16fc   :  { %p1794_p3 = pnand %p1792_p2, %p1789_p1 }
0x16fe   :  { %1797 = shalt.err (!%p1794_p3)
}
0x16ff   :  { %1363 = dma.vmem_to_hbm [thread:$0]  %s1358_s30, 256, %s2130_s4, [#allocation4], %s1806_s27, %s1806_s27, %s1807_s28  }
0x1700   :  { %1802 = dma.done.wait [#allocation4], 256  }
0x1701   :  { %1803 = vsyncadd [#allocation4], 4294967040 }
0x1702   :  { %1367 = vsyncpa [#allocation3], 1 }
0x1703   :  { %1368 = vsyncpa [#allocation6], 1 }
0x1704   :  { %1369 = vsyncpa [#allocation4], 1 }

</bundles_post_ra>
